<compile_context>
chip_gen: v5e
topology: v5e:2x2
jax: 0.10.0
libtpu: 0.0.40
codegen_flags: <defaults>
</compile_context>

<pallas_src>
import functools
import math

import jax
import jax.numpy as jnp
import numpy as np
from jax.experimental import pallas as pl
from jax.experimental.pallas import tpu as pltpu


def _round_up(x, m):
    return ((x + m - 1) // m) * m


# --------------------------------------------------------------------------
# Kernel 1: fused Q/K/V projection (row-tiled matmul + bias)
# --------------------------------------------------------------------------
def _qkv_proj_kernel(x_ref, w_ref, b_ref, o_ref):
    acc = jnp.dot(
        x_ref[...].astype(jnp.float32),
        w_ref[...].astype(jnp.float32),
        preferred_element_type=jnp.float32,
    )
    o_ref[...] = (acc + b_ref[...].astype(jnp.float32)).astype(o_ref.dtype)


# --------------------------------------------------------------------------
# Kernel 2: adjacency-masked multi-head attention over a tile of dst rows
# --------------------------------------------------------------------------
def _local_mha_kernel(q_ref, k_ref, v_ref, adj_ref, o_ref, *,
                      num_heads, head_dim, inv_scale, clip):
    q = q_ref[...].astype(jnp.float32)        # (TN, H*D)  dst-tile queries
    k = k_ref[...].astype(jnp.float32)        # (Np, H*D)  all source keys
    v = v_ref[...].astype(jnp.float32)        # (Np, H*D)  all source values
    adj = adj_ref[...].astype(jnp.float32)    # (TN, Np)   adj[dst, src]

    head_outs = []
    for h in range(num_heads):                # static loop, H is small
        lo = h * head_dim
        hi = lo + head_dim
        qh = q[:, lo:hi]
        kh = k[:, lo:hi]
        vh = v[:, lo:hi]

        # scores[dst, src] = <q_dst, k_src>   (MXU, contract last dims)
        s = jax.lax.dot_general(qh, kh, (((1,), (1,)), ((), ())),
                                preferred_element_type=jnp.float32)
        s = jnp.clip(s * inv_scale, -clip, clip)
        p = jnp.exp(s) * adj                  # non-edges -> 0 (exact DGL sum)

        wv = jnp.dot(p, vh, preferred_element_type=jnp.float32)   # (TN, D)
        z = jnp.sum(p, axis=-1, keepdims=True)                    # (TN, 1)
        inv_z = 1.0 / z                        # divide hoisted to width-1 col
        head_outs.append(wv * inv_z)

    # one lane-dense (TN, H*D) store; disjoint rows per grid step -> no RMW
    o_ref[...] = jnp.concatenate(head_outs, axis=-1).astype(o_ref.dtype)


# --------------------------------------------------------------------------
# Wrapper
# --------------------------------------------------------------------------
def local_multi_head_attention(node_feats, adj, wq, bq, wk, bk, wv, bv, *,
                               num_heads, num_output_feats, tile_n=128):
    """node_feats: [N, F_in]; adj[dst, src] in {0,1}; w*: [F_in, H*D]; b*: [H*D]."""
    N, f_in = node_feats.shape
    D = num_output_feats
    HD = num_heads * D
    dtype = node_feats.dtype
    clip = 5.0
    inv_scale = 1.0 / math.sqrt(D)

    # Row tiling (multiple of 8 sublanes); pad N so tiles divide evenly.
    tile_n = min(tile_n, _round_up(N, 8))
    n_pad = _round_up(N, tile_n)
    if n_pad != N:
        node_feats = jnp.pad(node_feats, ((0, n_pad - N), (0, 0)))
        adj = jnp.pad(adj, ((0, n_pad - N), (0, n_pad - N)))
    num_tiles = n_pad // tile_n

    w_qkv = jnp.concatenate([wq, wk, wv], axis=1)           # [F_in, 3*HD]
    b_qkv = jnp.concatenate([bq, bk, bv]).reshape(1, 3 * HD)

    # ---- Kernel 1: QKV projection (each node row touched exactly once) ----
    qkv = pl.pallas_call(
        _qkv_proj_kernel,
        out_shape=jax.ShapeDtypeStruct((n_pad, 3 * HD), dtype),
        grid_spec=pltpu.PrefetchScalarGridSpec(
            num_scalar_prefetch=0,
            grid=(num_tiles,),
            in_specs=[
                pl.BlockSpec((tile_n, f_in), lambda i: (i, 0)),     # x tile
                pl.BlockSpec((f_in, 3 * HD), lambda i: (0, 0)),     # W_qkv
                pl.BlockSpec((1, 3 * HD), lambda i: (0, 0)),        # b_qkv
            ],
            out_specs=pl.BlockSpec((tile_n, 3 * HD), lambda i: (i, 0)),
        ),
        compiler_params=pltpu.CompilerParams(
            dimension_semantics=("parallel",)),
        cost_estimate=pl.CostEstimate(
            flops=2 * n_pad * f_in * 3 * HD,
            transcendentals=0,
            bytes_accessed=4 * (n_pad * f_in + f_in * 3 * HD + n_pad * 3 * HD)),
    )(node_feats, w_qkv, b_qkv)

    q = qkv[:, :HD]
    k = qkv[:, HD:2 * HD]
    v = qkv[:, 2 * HD:]

    # ---- Kernel 2: masked attention over disjoint destination-row tiles ----
    kernel = functools.partial(_local_mha_kernel, num_heads=num_heads,
                               head_dim=D, inv_scale=inv_scale, clip=clip)
    out = pl.pallas_call(
        kernel,
        out_shape=jax.ShapeDtypeStruct((n_pad, HD), dtype),
        grid_spec=pltpu.PrefetchScalarGridSpec(
            num_scalar_prefetch=0,
            grid=(num_tiles,),
            in_specs=[
                pl.BlockSpec((tile_n, HD), lambda i: (i, 0)),       # Q dst tile
                pl.BlockSpec((n_pad, HD), lambda i: (0, 0)),        # K (all src)
                pl.BlockSpec((n_pad, HD), lambda i: (0, 0)),        # V (all src)
                pl.BlockSpec((tile_n, n_pad), lambda i: (i, 0)),    # adj rows
            ],
            out_specs=pl.BlockSpec((tile_n, HD), lambda i: (i, 0)),
        ),
        compiler_params=pltpu.CompilerParams(
            dimension_semantics=("parallel",)),
        cost_estimate=pl.CostEstimate(
            flops=4 * n_pad * n_pad * HD,
            transcendentals=num_heads * n_pad * n_pad,
            bytes_accessed=4 * (3 * n_pad * HD + n_pad * n_pad + n_pad * HD)),
    )(q, k, v, adj)

    return out[:N].reshape(N, num_heads, D)


# --------------------------------------------------------------------------
# Pure-JAX edge-list reference (mirrors DGL's message passing exactly)
# --------------------------------------------------------------------------
def _reference_edge_list(node_feats, src, dst, wq, bq, wk, bk, wv, bv,
                         num_heads, d):
    N = node_feats.shape[0]
    hp = jax.lax.Precision.HIGHEST
    q = (jnp.dot(node_feats, wq, precision=hp) + bq).reshape(N, num_heads, d)
    k = (jnp.dot(node_feats, wk, precision=hp) + bk).reshape(N, num_heads, d)
    v = (jnp.dot(node_feats, wv, precision=hp) + bv).reshape(N, num_heads, d)
    score = jnp.sum(k[src] * q[dst], axis=-1, keepdims=True)        # [E, H, 1]
    score = jnp.exp(jnp.clip(score / math.sqrt(d), -5.0, 5.0))
    wV = jnp.zeros((N, num_heads, d), jnp.float32).at[dst].add(score * v[src])
    z = jnp.zeros((N, num_heads, 1), jnp.float32).at[dst].add(score)
    return wV / z


if __name__ == "__main__":
    num_nodes = 48
    num_input_feats = 32
    num_output_feats = 32
    num_heads = 4
    HD = num_heads * num_output_feats

    key = jax.random.PRNGKey(0)
    k_feat, k_adj, k_q, k_k, k_v, k_bq, k_bk, k_bv = jax.random.split(key, 8)

    node_feats = jax.random.normal(
        k_feat, (num_nodes, num_input_feats), dtype=jnp.float32)

    # Random sparse graph + self-loops (every node has in-degree >= 1).
    adj_rand = jax.random.bernoulli(k_adj, 0.15, (num_nodes, num_nodes))
    adj = jnp.maximum(adj_rand.astype(jnp.float32),
                      jnp.eye(num_nodes, dtype=jnp.float32))

    # Deterministic Linear params (use_bias=True), modest scale.
    w_scale = 0.5 / math.sqrt(num_input_feats)
    wq = w_scale * jax.random.normal(k_q, (num_input_feats, HD), jnp.float32)
    wk = w_scale * jax.random.normal(k_k, (num_input_feats, HD), jnp.float32)
    wv = w_scale * jax.random.normal(k_v, (num_input_feats, HD), jnp.float32)
    bq = 0.1 * jax.random.normal(k_bq, (HD,), jnp.float32)
    bk = 0.1 * jax.random.normal(k_bk, (HD,), jnp.float32)
    bv = 0.1 * jax.random.normal(k_bv, (HD,), jnp.float32)

    out = local_multi_head_attention(
        node_feats, adj, wq, bq, wk, bk, wv, bv,
        num_heads=num_heads, num_output_feats=num_output_feats, tile_n=16)
    out = jax.block_until_ready(out)
    assert out.shape == (num_nodes, num_heads, num_output_feats)

    # Edge list derived from the same adjacency (adj[dst, src]).
    dst_idx, src_idx = np.nonzero(np.asarray(adj))
    ref = _reference_edge_list(node_feats, src_idx, dst_idx,
                               wq, bq, wk, bk, wv, bv,
                               num_heads, num_output_feats)

    assert jnp.allclose(out, ref, atol=5e-3, rtol=5e-3), "mismatch vs reference"

    print("KERNEL_OK")
</pallas_src>

<mosaic_0001>
module attributes {stable_mosaic.version = 11 : i64} {
  func.func @_qkv_proj_kernel(%arg0: i32, %arg1: memref<16x32xf32, #tpu.memory_space<vmem>>, %arg2: memref<32x384xf32, #tpu.memory_space<vmem>>, %arg3: memref<1x384xf32, #tpu.memory_space<vmem>>, %arg4: memref<16x384xf32, #tpu.memory_space<vmem>>) attributes {dimension_semantics = [#tpu.dimension_semantics<parallel>], iteration_bounds = array<i64: 3>, scalar_prefetch = 0 : i64, scratch_operands = 0 : i64, tpu.core_type = #tpu.core_type<tc>, window_params = [{transform_indices = @transform_0, window_bounds = array<i64: 16, 32>}, {pipeline_mode = #tpu.pipeline_mode<synchronous>, transform_indices = @transform_1, window_bounds = array<i64: 32, 384>}, {pipeline_mode = #tpu.pipeline_mode<synchronous>, transform_indices = @transform_2, window_bounds = array<i64: 1, 384>}, {transform_indices = @transform_3, window_bounds = array<i64: 16, 384>}]} {
    %c0 = arith.constant 0 : index
    %c0_0 = arith.constant 0 : index
    %0 = vector.load %arg1[%c0, %c0_0] : memref<16x32xf32, #tpu.memory_space<vmem>>, vector<16x32xf32>
    %c0_1 = arith.constant 0 : index
    %c0_2 = arith.constant 0 : index
    %1 = vector.load %arg2[%c0_1, %c0_2] : memref<32x384xf32, #tpu.memory_space<vmem>>, vector<32x384xf32>
    %cst = arith.constant dense<0.000000e+00> : vector<16x384xf32>
    %2 = tpu.matmul %0, %1, %cst {dimension_numbers = #tpu.dot_dimension_numbers<[1], [0], [0], [1], [0, 0, 1, 1], [], []>} : vector<16x32xf32>, vector<32x384xf32>, vector<16x384xf32> -> vector<16x384xf32>
    %c0_3 = arith.constant 0 : index
    %c0_4 = arith.constant 0 : index
    %3 = vector.load %arg3[%c0_3, %c0_4] : memref<1x384xf32, #tpu.memory_space<vmem>>, vector<1x384xf32>
    %4 = vector.broadcast %3 : vector<1x384xf32> to vector<16x384xf32>
    %5 = arith.addf %2, %4 : vector<16x384xf32>
    %c0_5 = arith.constant 0 : index
    %c0_6 = arith.constant 0 : index
    %6 = vector.load %arg4[%c0_5, %c0_6] : memref<16x384xf32, #tpu.memory_space<vmem>>, vector<16x384xf32>
    tpu.vector_store %arg4[%c0_5, %c0_6], %5 {strides = array<i32>} : memref<16x384xf32, #tpu.memory_space<vmem>>, vector<16x384xf32>,
    return
  }
  func.func @transform_0(%arg0: i32) -> (i32, i32) {
    %c0_i32 = arith.constant 0 : i32
    %c0_i32_0 = arith.constant 0 : i32
    return %arg0, %c0_i32 : i32, i32
  }
  func.func @transform_1(%arg0: i32) -> (i32, i32) {
    %c0_i32 = arith.constant 0 : i32
    %c0_i32_0 = arith.constant 0 : i32
    %c0_i32_1 = arith.constant 0 : i32
    return %c0_i32, %c0_i32_0 : i32, i32
  }
  func.func @transform_2(%arg0: i32) -> (i32, i32) {
    %c0_i32 = arith.constant 0 : i32
    %c0_i32_0 = arith.constant 0 : i32
    %c0_i32_1 = arith.constant 0 : i32
    return %c0_i32, %c0_i32_0 : i32, i32
  }
  func.func @transform_3(%arg0: i32) -> (i32, i32) {
    %c0_i32 = arith.constant 0 : i32
    %c0_i32_0 = arith.constant 0 : i32
    return %arg0, %c0_i32 : i32, i32
  }
}

</mosaic_0001>

<bundles_post_ra>
// kernel: tpu_custom_call.1
= control target key start
LH: loop header
LB: loop body
LE: loop exit
PB: predicated region body
PF: predicated region fallthrough
CT: control target
= control target key end

     0   :  { %8 = vsyncpa [#allocation3], 0  ;;  %s693_s0 = inlined_call_operand.vmem [shape: f32[48,32], index: 0, kind: input, shape index: {}]   ;;  %s694_s1 = inlined_call_operand.hbm [shape: f32[32,384], index: 1, kind: input, shape index: {}]   ;;  %s695_s2 = inlined_call_operand.vmem [shape: f32[1,384], index: 2, kind: input, shape index: {}]   ;;  %s696_s3 = inlined_call_operand.hbm [shape: f32[48,384], index: 3, kind: output, shape index: {}]  }
   0x1   :  { %9 = vsyncpa [#allocation4], 0 }
   0x2   :  { %11 = vsyncpa [#allocation4 + $0x1], 0  ;;  %s586_s12 = smov 0   ;;  %s588_s13 = smov 0  }
   0x3   :  { %s590_s14 = smov 0   ;;  %s592_s15 = smov 0  }
   0x4 LB: > { %s607_s16 = sadd.s32 4294967295, %s559_s15   ;;  %s384_s17 = sadd.s32 4294967294, %s559_s15   ;;  %s559_s15 = sphi %s592_s15, %s702_s15   ;;  %s555_s14 = sphi %s590_s14, %s701_s14   ;;  %s551_s13 = sphi %s588_s13, %s700_s13   ;;  %s547_s12 = sphi %s586_s12, %s699_s12  }
   0x5   : > { %s611_s18 = sadd.s32 1, %s559_s15   ;;  %s92_s19 = sadd.s32 1, %s555_s14 }
   0x6   : > { %s89_s20 = ssub.s32 %s559_s15, %s611_s18  ;;  %p102_p0 = scmp.ne.s32.totalorder %s555_s14, %s551_s13 }
   0x7   : > { %p90_p1 = scmp.eq.s32.totalorder %s89_s20, 0  ;;  %p103_p2 = scmp.eq.s32.totalorder %s607_s16, 2 }
   0x8   : > { %p108_p3 = scmp.ne.s32.totalorder %s551_s13, %s547_s12  ;;  %p109_p4 = scmp.eq.s32.totalorder %s384_s17, 2 }
   0x9   : > { %s622_s21 = scalar_select %p90_p1, %s555_s14, %s92_s19  }
   0xa   : > { %p624_p5 = por %p103_p2, %p102_p0  ;;  %p628_p6 = por %p109_p4, %p108_p3 }
   0xb   : > { %p385_p7 = scmp.ge.s32.totalorder %s559_s15, 1  ;;  %p116_p8 = scmp.lt.s32.totalorder %s559_s15, 4 }
   0xc   : > { %p423_p9 = scmp.eq.s32.totalorder %s607_s16, 0  ;;  %s127_s26 = sshll.u32 %s694_s1, 4  ;;  %s128_s26 = int_to_ptr.hbm [resolvable:$true] %s127_s26 }
   0xd   : > { %p117_p10 = pnand %p385_p7, %p116_p8  ;;  %s561_s27 = smov [#allocation2]  }
   0xe   : > { %s129_s28 = sshll.u32 %s561_s27, 4  ;;  %s562_s29 = smov 384   ;;  %s130_s28 = int_to_ptr.vmem [resolvable:$true] %s129_s28 }
   0xf   : > { %p415_p11 = pneg %p117_p10  ;;  %s563_s30 = smov 24  }
  0x10   : > { %157 = sbr.rel (%p117_p10) target bundleno = 176 (0xb0), region = 32 }
  0x11   : > { %p416_p12 = pnand %p423_p9, %p415_p11 }
  0x13   : > { %418 = dma.hbm_to_vmem [thread:$0]  (!%p416_p12), %s128_s26, 1536, %s130_s28, [#allocation3], %s562_s29, %s562_s29, %s563_s30  }
  0x15   : > { %538 = dma.done.wait (%p423_p9), [#allocation3], 1536  }
  0x16   : > { %540 = vsyncadd (%p423_p9), [#allocation3], 4294965760  ;;  %s390_s4 = sshll.u32 %s607_s16, 1  ;;  %v202_v0 = vld [vmem:[#allocation2 + $0x58] sm:$0xff]  ;;  %v199_v1 = vld [vmem:[#allocation2 + $0x40] sm:$0xff]  ;;  %vm211_vm0 = vcmask 261120  }
  0x17   : > { %p183_p13 = scmp.lt.s32.totalorder %s390_s4, 5  ;;  %276 = vmatpush.msra.mxu2 %v202_v0  ;;  %v196_v2 = vld [vmem:[#allocation2 + $0x28] sm:$0xff]  ;;  %v201_v3 = vld [vmem:[#allocation2 + $0x50] sm:$0xff]  ;;  %v198_v5 = vld [vmem:[#allocation2 + $0x38] sm:$0xff]  ;;  %s179_s9 = sand.u32 1, %s551_s13  }
  0x18   : > { %253 = vmatpush.msra.mxu1 %v201_v3  ;;  %v200_v4 = vld [vmem:[#allocation2 + $0x48] sm:$0xff]  ;;  %v197_v6 = vld [vmem:[#allocation2 + $0x30] sm:$0xff]  ;;  %v195_v7 = vld [vmem:[#allocation2 + $0x20] sm:$0xff]  ;;  %s407_s17 = smul.u32 48, %s179_s9  ;;  %s513_s6 = scalar_lea.hbm %s696_s3, 144 }
  0x19   : > { %s704_s4 = smov (!%p183_p13, %s390_s4), 5  ;;  %277 = vmatpush.msra.mxu2 %v199_v1  ;;  %403 = vmatpush.msra.mxu3 %v200_v4  ;;  %v193_v8 = vld [vmem:[#allocation2 + $0x10] sm:$0xff]  ;;  %v194_v9 = vld [vmem:[#allocation2 + $0x18] sm:$0xff]  ;;  %v192_v11 = vld [vmem:[#allocation2 + $0x8] sm:$0xff]  ;;  %s408_s20 = smul.u32 48, %s607_s16 }
  0x1a   : > { %s391_s5 = sshll.u32 %s704_s4, 3  ;;  %254 = vmatpush.msra.mxu1 %v198_v5  ;;  %230 = vmatpush.msra.mxu0 %v200_v4  ;;  %v191_v12 = vld [vmem:[#allocation2] sm:$0xff]  ;;  %s181_s19 = scalar_lea.vmem [#allocation5], %s407_s17 }
  0x1b   : > { %s186_s8 = scalar_lea.vmem %s693_s0, %s391_s5  ;;  %278 = vmatpush.msra.mxu2 %v196_v2  ;;  %404 = vmatpush.msra.mxu3 %v197_v6  ;;  %v203_v14 = vld [vmem:[%s695_s2] sm:$0x7]  ;;  %s306_s26 = scalar_lea.hbm %s696_s3, %s408_s20 }
  0x1c   : > { %v189_v10 = vld [vmem:[%s186_s8] sm:$0xff]  ;;  %255 = vmatpush.msra.mxu1 %v195_v7  ;;  %231 = vmatpush.msra.mxu0 %v197_v6  ;;  %v190_v13 = vld [vmem:[%s186_s8 + $0x8] sm:$0xff]  ;;  %v206_v15 = vperm.slane %v203_v14, 1  ;;  %v205_v18 = vperm.slane %v203_v14, 0  ;;  %v207_v19 = vperm.slane %v203_v14, 2  ;;  %s307_s27 = sshll.u32 %s181_s19, 4  ;;  %s308_s27 = int_to_ptr.vmem [resolvable:$true] %s307_s27 }
  0x1d   : > { %279 = vmatpush.msra.mxu2 %v193_v8  ;;  %405 = vmatpush.msra.mxu3 %v194_v9  ;;  %s309_s28 = sshll.u32 %s306_s26, 4  ;;  %s294_s16 = scalar_lea.sflag [#allocation4], %s179_s9  ;;  %s310_s28 = int_to_ptr.hbm [resolvable:$true] %s309_s28 }
  0x1e   : > { %396 = vmatmul.msk.f32.vlgmr.msra.gmra.mxu2 %vm211_vm0, %v189_v10  ;;  %256 = vmatpush.msra.mxu1 %v192_v11  ;;  %s507_s29 = sshra.s32 %s310_s28, 4  ;;  %s508_s29 = int_to_ptr.hbm [resolvable:$true] %s507_s29 }
  0x1f   : > { %394 = vmatmul.msk.f32.vlgmr.msra.gmra.mxu1 %vm211_vm0, %v189_v10  ;;  %406 = vmatpush.msra.mxu3 %v191_v12  ;;  %s509_s30 = scalar_lea.hbm %s508_s29, 48  ;;  %p514_p3 = scmp.lt.s32.totalorder %s508_s29, %s696_s3 }
  0x20   : > { %393 = vmatmul.msk.f32.vlgmr.msra.gmra.mxu3 %vm211_vm0, %v190_v13  ;;  %232 = vmatpush.msra.mxu0 %v194_v9  ;;  %p510_p0 = scmp.ne.s32.totalorder %s508_s29, %s509_s30  ;;  %p515_p4 = scmp.lt.s32.totalorder %s513_s6, %s509_s30 }
  0x22   : > { %233 = vmatpush.msra.mxu0 %v191_v12  ;;  %p511_p1 = pnand %p510_p0, %p624_p5  ;;  %p516_p7 = por %p515_p4, %p514_p3 }
  0x23   : > { %392 = vmatmul.msk.f32.vlgmr.msra.gmra.mxu0 %vm211_vm0, %v189_v10 }
  0x24   : > { %p512_p2 = pneg %p511_p1 }
  0x26   : > { %397 = vmatmul.msk.f32.gmra.mxu2 %vm211_vm0, %v190_v13  ;;  %p517_p8 = pnand %p516_p7, %p512_p2 }
  0x27   : > { %395 = vmatmul.msk.f32.gmra.mxu1 %vm211_vm0, %v190_v13 }
  0x9c   : > { %v258_v16 = vpop.f32.mrf.mxu1 }
  0x9d   : > { %v259_v17 = vadd.f32 %v258_v16, %v206_v15 }
  0x9f   : > { %288 = vst [vmem:[%s181_s19 + $0x8] sm:$0xff] %v259_v17 }
  0xa0   : > { %v235_v20 = vpop.f32.mrf.mxu0 }
  0xa1   : > { %v281_v21 = vpop.f32.mrf.mxu2  ;;  %v236_v22 = vadd.f32 %v235_v20, %v205_v18 }
  0xa2   : > { %v282_v23 = vadd.f32 %v281_v21, %v207_v19 }
  0xa3   : > { %287 = vst [vmem:[%s181_s19] sm:$0xff] %v236_v22  ;;  %v238_v24 = vpop.f32.mrf.mxu3 }
  0xa4   : > { %289 = vst [vmem:[%s181_s19 + $0x10] sm:$0xff] %v282_v23  ;;  %v239_v25 = vadd.f32 %v238_v24, %v205_v18  ;;  %v261_v26 = vpop.f32.mrf.mxu1 }
  0xa5   : > { %v262_v27 = vadd.f32 %v261_v26, %v206_v15 }
  0xa6   : > { %290 = vst [vmem:[%s181_s19 + $0x18] sm:$0xff] %v239_v25 }
  0xa7   : > { %291 = vst [vmem:[%s181_s19 + $0x20] sm:$0xff] %v262_v27 }
  0xa9   : > { %v284_v28 = vpop.f32.mrf.mxu2 }
  0xaa   : > { %v285_v29 = vadd.f32 %v284_v28, %v207_v19 }
  0xac   : > { %292 = vst [vmem:[%s181_s19 + $0x28] sm:$0xff] %v285_v29 }
  0xad   : > { %520 = shalt.err (!%p517_p8)
}
  0xae   : > { %s564_s9 = smov 384   ;;  %s565_s10 = smov 24  }
  0xaf   : > { %413 = dma.vmem_to_hbm [thread:$0]  (%p624_p5), %s308_s27, 768, %s310_s28, %s294_s16, %s564_s9, %s564_s9, %s565_s10  }
  0xb0 PF: > { %p425_p9 = scmp.ge.s32.totalorder %s559_s15, 2  ;;  %s324_s11 = sand.u32 1, %s547_s12  }
  0xb1   : > { %s325_s17 = scalar_lea.sflag [#allocation4], %s324_s11 }
  0xb2   : > { %p420_p10 = pnand %p425_p9, %p628_p6 }
  0xb4   : > { %p421_p11 = pneg %p420_p10 }
  0xb6   : > { %542 = dma.done.wait (%p421_p11), %s325_s17, 768  }
  0xb7   : > { %544 = vsyncadd (%p421_p11), %s325_s17, 4294966528  ;;  %p14_p12 = scmp.ge.s32.totalorder %s611_s18, 5   ;;  %s699_s12 = smov %s551_s13 }
  0xb8   : > { %s700_s13 = smov %s555_s14  ;;  %s701_s14 = smov %s622_s21 }
  0xb9   : > { %s702_s15 = smov %s611_s18  ;;  %16 = sbr.rel (!%p14_p12) target bundleno = 4 (0x4), region = 72 }
  0xbe   :  { %331 = vsyncpa [#allocation3], 1 }
  0xbf   :  { %333 = vsyncpa [#allocation3 + $0x1], 1 }
  0xc0   :  { %334 = vsyncpa [#allocation4], 1 }
  0xc1   :  { %336 = vsyncpa [#allocation4 + $0x1], 1 }

</bundles_post_ra>
